<compile_context>
chip_gen: v7x
topology: tpu7x:2x2x1
jax: 0.10.0
libtpu: 0.0.40
codegen_flags: <defaults>
</compile_context>

<pallas_src>
import functools
import math

import jax
import jax.numpy as jnp
import numpy as np
from jax.experimental import pallas as pl
from jax.experimental.pallas import tpu as pltpu


_NUM_SPLITS = 2                  # leading "parallel" grid axis (2 TCs on v7x).
_TILE_BYTES = 2 * 1024 * 1024    # ~2 MiB per input buffer, safe on all generations.


def _round_up(x, m):
    return ((x + m - 1) // m) * m


def _yolo_loss_kernel(w_bce_ref, w_mse_ref, pred_ref, tgt_ref, out_ref, acc_ref):
    """One (TILE_M, LANE) tile: fused weighted BCE + MSE partial sum."""
    step = pl.program_id(1)

    @pl.when(step == 0)
    def _init():
        acc_ref[...] = jnp.zeros_like(acc_ref)

    p = pred_ref[...].astype(jnp.float32)
    t = tgt_ref[...].astype(jnp.float32)
    w_bce = w_bce_ref[0:1, :]        # (1, LANE) broadcast row
    w_mse = w_mse_ref[0:1, :]

    # BCE with PyTorch's -100 clamp on the log terms.  Box lanes (w_bce == 0)
    # are replaced by 0.5 before the logs so out-of-range box values cannot
    # inject NaN (0 * NaN = NaN would survive the weighting).
    p_safe = jnp.where(w_bce > 0.0, p, 0.5)
    log_p = jnp.maximum(jnp.log(p_safe), -100.0)        # EUP
    log_1mp = jnp.maximum(jnp.log(1.0 - p_safe), -100.0)  # EUP
    # -(t*log_p + (1-t)*log_1mp) rewritten with one fewer multiply.
    bce = -(log_1mp + t * (log_p - log_1mp))
    diff = p - t
    sq = diff * diff

    # Weights already contain the global-mean denominators: one fused
    # weighted sum replaces the 3 masks / 3 selects / 3 reductions.
    weighted = w_bce * bce + w_mse * sq              # (TILE_M, LANE)
    tm, lane = weighted.shape
    # Fold the tile into the vreg-shaped accumulator with pure VALU adds; the
    # expensive cross-lane/sublane reduce happens once per split (epilogue).
    acc_ref[...] += jnp.sum(weighted.reshape(tm // 8, 8, lane), axis=0)

    @pl.when(step == pl.num_programs(1) - 1)
    def _finalize():
        total = jnp.sum(acc_ref[...])                # single XLU reduce / split
        out_ref[...] = jnp.full(out_ref.shape, total, dtype=jnp.float32)


@functools.partial(jax.jit, static_argnums=(2,))
def yolo_loss_pallas(predictions, targets, num_classes):
    d = 5 + num_classes
    assert predictions.shape[-1] == d, "last dim must be 5 + num_classes"
    assert predictions.shape == targets.shape
    assert num_classes >= 1

    p2 = predictions.reshape(-1, d).astype(jnp.float32)
    t2 = targets.reshape(-1, d).astype(jnp.float32)
    n_rows = p2.shape[0]

    # Lane-dense layout: pack k attribute rows into one LANE = k*D row with
    # LANE a multiple of 128 so every vreg lane carries data.
    k = 128 // math.gcd(d, 128)
    lane = k * d

    # Tile sizing: ~2 MiB per input buffer (2 inputs x 2 pipeline buffers = 8 MiB).
    m = pl.cdiv(n_rows, k)
    tile_m = max(8, (_TILE_BYTES // (lane * 4)) // 8 * 8)
    tile_m = min(tile_m, _round_up(pl.cdiv(m, _NUM_SPLITS), 8))
    steps = pl.cdiv(m, _NUM_SPLITS * tile_m)
    m_padded = _NUM_SPLITS * steps * tile_m
    n_padded = m_padded * k

    # Pad rows with pred = tgt = 1.0:
    #   BCE = -(1*log(1) + 0*clamp(log 0)) = 0 and MSE = (1-1)^2 = 0.
    # (Skipped entirely when shapes already tile evenly -> zero extra HBM copy.)
    pad = n_padded - n_rows
    if pad:
        p2 = jnp.pad(p2, ((0, pad), (0, 0)), constant_values=1.0)
        t2 = jnp.pad(t2, ((0, pad), (0, 0)), constant_values=1.0)
    p_lane = p2.reshape(m_padded, lane)
    t_lane = t2.reshape(m_padded, lane)

    # Per-column weights with the global-mean denominators folded in (uses the
    # ORIGINAL n_rows, so padding and tiling never change the normalization).
    col = np.arange(lane) % d
    w_bce_row = np.where(
        col == 0, 1.0 / n_rows,
        np.where(col >= 5, 1.0 / (n_rows * num_classes), 0.0))
    w_mse_row = np.where((col >= 1) & (col < 5), 1.0 / (n_rows * 4.0), 0.0)
    w_bce = jnp.asarray(np.broadcast_to(w_bce_row, (8, lane)), jnp.float32)
    w_mse = jnp.asarray(np.broadcast_to(w_mse_row, (8, lane)), jnp.float32)

    data_spec = pl.BlockSpec((tile_m, lane), lambda c, i: (c * steps + i, 0))
    weight_spec = pl.BlockSpec((8, lane), lambda c, i: (0, 0))

    out = pl.pallas_call(
        _yolo_loss_kernel,
        out_shape=jax.ShapeDtypeStruct((_NUM_SPLITS, 8, 128), jnp.float32),
        grid_spec=pltpu.PrefetchScalarGridSpec(
            num_scalar_prefetch=0,
            grid=(_NUM_SPLITS, steps),
            in_specs=[weight_spec, weight_spec, data_spec, data_spec],
            out_specs=pl.BlockSpec((1, 8, 128), lambda c, i: (c, 0, 0)),
            scratch_shapes=[pltpu.VMEM((8, lane), jnp.float32)],
        ),
        compiler_params=pltpu.CompilerParams(
            dimension_semantics=("parallel", "arbitrary")),
    )(w_bce, w_mse, p_lane, t_lane)

    # Each split's block is broadcast-filled with its partial loss; take one
    # element per split and add the halves (fused into the jitted epilogue).
    return jnp.sum(out[:, 0, 0])


def yolo_loss_ref(predictions, targets, num_classes):
    # Pure-JAX reference mirroring the PyTorch module.
    p = predictions.astype(jnp.float32)
    t = targets.astype(jnp.float32)

    def bce(pp, tt):
        log_p = jnp.maximum(jnp.log(pp), -100.0)
        log_1mp = jnp.maximum(jnp.log(1.0 - pp), -100.0)
        return jnp.mean(-(tt * log_p + (1.0 - tt) * log_1mp))

    conf_loss = bce(p[..., 0], t[..., 0])
    box_loss = jnp.mean((p[..., 1:5] - t[..., 1:5]) ** 2)
    class_loss = bce(p[..., 5:], t[..., 5:])
    return conf_loss + box_loss + class_loss


if __name__ == "__main__":
    num_classes = 3
    D = 5 + num_classes
    # Small YOLO-like prediction grid: (batch=2, anchors=3, gy=8, gx=8, 5+C)
    shape = (2, 3, 8, 8, D)

    key = jax.random.PRNGKey(0)
    k_pred, k_tgt = jax.random.split(key)
    # Predictions must lie in (0, 1) for BCE -> sigmoid of gaussian logits.
    predictions = jax.nn.sigmoid(jax.random.normal(k_pred, shape, jnp.float32))
    # Targets: conf/class in [0, 1]; box values also in [0, 1] (valid for MSE).
    targets = jax.random.uniform(k_tgt, shape, jnp.float32)

    total = jax.block_until_ready(
        yolo_loss_pallas(predictions, targets, num_classes))
    ref = jax.block_until_ready(yolo_loss_ref(predictions, targets, num_classes))
    assert jnp.allclose(total, ref, rtol=1e-5, atol=1e-5), (total, ref)

    print("KERNEL_OK")
</pallas_src>

<mosaic_0001>
module attributes {stable_mosaic.version = 11 : i64} {
  func.func @_yolo_loss_kernel(%arg0: i32, %arg1: i32, %arg2: memref<8x128xf32, #tpu.memory_space<vmem>>, %arg3: memref<8x128xf32, #tpu.memory_space<vmem>>, %arg4: memref<16x128xf32, #tpu.memory_space<vmem>>, %arg5: memref<16x128xf32, #tpu.memory_space<vmem>>, %arg6: memref<1x8x128xf32, #tpu.memory_space<vmem>>, %arg7: memref<8x128xf32, #tpu.memory_space<vmem>>) attributes {dimension_semantics = [#tpu.dimension_semantics<parallel>, #tpu.dimension_semantics<arbitrary>], iteration_bounds = array<i64: 2, 1>, scalar_prefetch = 0 : i64, scratch_operands = 1 : i64, tpu.core_type = #tpu.core_type<tc>, window_params = [{pipeline_mode = #tpu.pipeline_mode<synchronous>, transform_indices = @transform_0, window_bounds = array<i64: 8, 128>}, {pipeline_mode = #tpu.pipeline_mode<synchronous>, transform_indices = @transform_1, window_bounds = array<i64: 8, 128>}, {transform_indices = @transform_2, window_bounds = array<i64: 16, 128>}, {transform_indices = @transform_3, window_bounds = array<i64: 16, 128>}, {transform_indices = @transform_4, window_bounds = array<i64: 1, 8, 128>}]} {
    %c0_i32 = arith.constant 0 : i32
    %0 = arith.cmpi eq, %arg1, %c0_i32 : i32
    %1 = arith.extui %0 : i1 to i32
    %c0_i32_0 = arith.constant 0 : i32
    %2 = arith.cmpi ne, %1, %c0_i32_0 : i32
    scf.if %2 {
      %cst_20 = arith.constant 0.000000e+00 : f32
      %41 = vector.broadcast %cst_20 : f32 to vector<8x128xf32>
      %c0_21 = arith.constant 0 : index
      %c0_22 = arith.constant 0 : index
      %42 = vector.load %arg7[%c0_21, %c0_22] : memref<8x128xf32, #tpu.memory_space<vmem>>, vector<8x128xf32>
      tpu.vector_store %arg7[%c0_21, %c0_22], %41 {strides = array<i32>} : memref<8x128xf32, #tpu.memory_space<vmem>>, vector<8x128xf32>,
    } else {
    }
    %c0 = arith.constant 0 : index
    %c0_1 = arith.constant 0 : index
    %3 = vector.load %arg4[%c0, %c0_1] : memref<16x128xf32, #tpu.memory_space<vmem>>, vector<16x128xf32>
    %c0_2 = arith.constant 0 : index
    %c0_3 = arith.constant 0 : index
    %4 = vector.load %arg5[%c0_2, %c0_3] : memref<16x128xf32, #tpu.memory_space<vmem>>, vector<16x128xf32>
    %c0_4 = arith.constant 0 : index
    %c0_5 = arith.constant 0 : index
    %5 = vector.load %arg2[%c0_4, %c0_5] : memref<8x128xf32, #tpu.memory_space<vmem>>, vector<1x128xf32>
    %c0_6 = arith.constant 0 : index
    %c0_7 = arith.constant 0 : index
    %6 = vector.load %arg3[%c0_6, %c0_7] : memref<8x128xf32, #tpu.memory_space<vmem>>, vector<1x128xf32>
    %cst = arith.constant 0.000000e+00 : f32
    %7 = vector.broadcast %cst : f32 to vector<1x128xf32>
    %8 = arith.cmpf ogt, %5, %7 : vector<1x128xf32>
    %cst_8 = arith.constant 5.000000e-01 : f32
    %9 = vector.shape_cast %8 : vector<1x128xi1> to vector<1x128xi1>
    %10 = vector.broadcast %9 : vector<1x128xi1> to vector<16x128xi1>
    %11 = vector.broadcast %cst_8 : f32 to vector<16x128xf32>
    %12 = arith.select %10, %3, %11 : vector<16x128xi1>, vector<16x128xf32>
    %13 = math.log %12 : vector<16x128xf32>
    %cst_9 = arith.constant -1.000000e+02 : f32
    %14 = vector.broadcast %cst_9 : f32 to vector<16x128xf32>
    %15 = arith.maximumf %13, %14 : vector<16x128xf32>
    %cst_10 = arith.constant 1.000000e+00 : f32
    %16 = vector.broadcast %cst_10 : f32 to vector<16x128xf32>
    %17 = arith.subf %16, %12 : vector<16x128xf32>
    %18 = math.log %17 : vector<16x128xf32>
    %cst_11 = arith.constant -1.000000e+02 : f32
    %19 = vector.broadcast %cst_11 : f32 to vector<16x128xf32>
    %20 = arith.maximumf %18, %19 : vector<16x128xf32>
    %21 = arith.subf %15, %20 : vector<16x128xf32>
    %22 = arith.mulf %4, %21 : vector<16x128xf32>
    %23 = arith.addf %20, %22 : vector<16x128xf32>
    %cst_12 = arith.constant 0.000000e+00 : f32
    %24 = vector.broadcast %cst_12 : f32 to vector<16x128xf32>
    %25 = arith.subf %24, %23 : vector<16x128xf32>
    %26 = arith.subf %3, %4 : vector<16x128xf32>
    %27 = arith.mulf %26, %26 : vector<16x128xf32>
    %28 = vector.broadcast %5 : vector<1x128xf32> to vector<16x128xf32>
    %29 = arith.mulf %28, %25 : vector<16x128xf32>
    %30 = vector.broadcast %6 : vector<1x128xf32> to vector<16x128xf32>
    %31 = arith.mulf %30, %27 : vector<16x128xf32>
    %32 = arith.addf %29, %31 : vector<16x128xf32>
    %c0_13 = arith.constant 0 : index
    %c0_14 = arith.constant 0 : index
    %33 = vector.load %arg7[%c0_13, %c0_14] : memref<8x128xf32, #tpu.memory_space<vmem>>, vector<8x128xf32>
    %34 = vector.shape_cast %32 : vector<16x128xf32> to vector<2x8x128xf32>
    %cst_15 = arith.constant dense<0.000000e+00> : vector<8x128xf32>
    %35 = vector.multi_reduction <add>, %34, %cst_15 [0] : vector<2x8x128xf32> to vector<8x128xf32>
    %36 = arith.addf %33, %35 : vector<8x128xf32>
    %c0_16 = arith.constant 0 : index
    %c0_17 = arith.constant 0 : index
    %37 = vector.load %arg7[%c0_16, %c0_17] : memref<8x128xf32, #tpu.memory_space<vmem>>, vector<8x128xf32>
    tpu.vector_store %arg7[%c0_16, %c0_17], %36 {strides = array<i32>} : memref<8x128xf32, #tpu.memory_space<vmem>>, vector<8x128xf32>,
    %c0_i32_18 = arith.constant 0 : i32
    %38 = arith.cmpi eq, %arg1, %c0_i32_18 : i32
    %39 = arith.extui %38 : i1 to i32
    %c0_i32_19 = arith.constant 0 : i32
    %40 = arith.cmpi ne, %39, %c0_i32_19 : i32
    scf.if %40 {
      %c0_20 = arith.constant 0 : index
      %c0_21 = arith.constant 0 : index
      %41 = vector.load %arg7[%c0_20, %c0_21] : memref<8x128xf32, #tpu.memory_space<vmem>>, vector<8x128xf32>
      %42 = vector.shape_cast %41 : vector<8x128xf32> to vector<1x8x128xf32>
      %cst_22 = arith.constant dense<0.000000e+00> : vector<1xf32>
      %43 = vector.multi_reduction <add>, %42, %cst_22 [1, 2] : vector<1x8x128xf32> to vector<1xf32>
      %44 = vector.shape_cast %43 : vector<1xf32> to vector<1x1x1xf32>
      %45 = vector.extract %44[0, 0, 0] : f32 from vector<1x1x1xf32>
      %46 = vector.broadcast %45 : f32 to vector<1x8x128xf32>
      %c0_23 = arith.constant 0 : index
      %c0_24 = arith.constant 0 : index
      %c0_25 = arith.constant 0 : index
      %47 = vector.load %arg6[%c0_23, %c0_24, %c0_25] : memref<1x8x128xf32, #tpu.memory_space<vmem>>, vector<1x8x128xf32>
      tpu.vector_store %arg6[%c0_23, %c0_24, %c0_25], %46 {strides = array<i32>} : memref<1x8x128xf32, #tpu.memory_space<vmem>>, vector<1x8x128xf32>,
    } else {
    }
    return
  }
  func.func @transform_0(%arg0: i32, %arg1: i32) -> (i32, i32) {
    %c0_i32 = arith.constant 0 : i32
    %c0_i32_0 = arith.constant 0 : i32
    %c0_i32_1 = arith.constant 0 : i32
    return %c0_i32, %c0_i32_0 : i32, i32
  }
  func.func @transform_1(%arg0: i32, %arg1: i32) -> (i32, i32) {
    %c0_i32 = arith.constant 0 : i32
    %c0_i32_0 = arith.constant 0 : i32
    %c0_i32_1 = arith.constant 0 : i32
    return %c0_i32, %c0_i32_0 : i32, i32
  }
  func.func @transform_2(%arg0: i32, %arg1: i32) -> (i32, i32) {
    %c1_i32 = arith.constant 1 : i32
    %0 = arith.muli %arg0, %c1_i32 : i32
    %1 = arith.addi %0, %arg1 : i32
    %c0_i32 = arith.constant 0 : i32
    %c0_i32_0 = arith.constant 0 : i32
    return %1, %c0_i32 : i32, i32
  }
  func.func @transform_3(%arg0: i32, %arg1: i32) -> (i32, i32) {
    %c1_i32 = arith.constant 1 : i32
    %0 = arith.muli %arg0, %c1_i32 : i32
    %1 = arith.addi %0, %arg1 : i32
    %c0_i32 = arith.constant 0 : i32
    %c0_i32_0 = arith.constant 0 : i32
    return %1, %c0_i32 : i32, i32
  }
  func.func @transform_4(%arg0: i32, %arg1: i32) -> (i32, i32, i32) {
    %c0_i32 = arith.constant 0 : i32
    %c0_i32_0 = arith.constant 0 : i32
    %c0_i32_1 = arith.constant 0 : i32
    return %arg0, %c0_i32, %c0_i32_0 : i32, i32, i32
  }
}

</mosaic_0001>

<bundles_post_ra>
// kernel: yolo_loss_pallas.1
= control target key start
LH: loop header
LB: loop body
LE: loop exit
PB: predicated region body
PF: predicated region fallthrough
CT: control target
= control target key end

     0   :  { %s496_s15 = smov 0   ;;  %s498_s16 = smov 0   ;;  %s543_s0 = inlined_call_operand.vmem [shape: f32[8,128], index: 0, kind: input, shape index: {}]   ;;  %s544_s1 = inlined_call_operand.vmem [shape: f32[8,128], index: 1, kind: input, shape index: {}]   ;;  %s545_s2 = inlined_call_operand.vmem [shape: f32[32,128], index: 2, kind: input, shape index: {}]   ;;  %s546_s3 = inlined_call_operand.vmem [shape: f32[32,128], index: 3, kind: input, shape index: {}]   ;;  %s547_s4 = inlined_call_operand.vmem [shape: f32[2,8,128], index: 4, kind: output, shape index: {}]  }
   0x1   :  { %s500_s17 = smov 0  }
   0x2 LB: > { %s26_s18 = sadd.s32 1, %s464_s16  ;;  %p402_p0 = scmp.ge.s32.totalorder %s468_s17, 1  ;;  %s468_s17 = sphi %s500_s17, %s14_s17   ;;  %s464_s16 = sphi %s498_s16, %s549_s16   ;;  %s460_s15 = sphi %s496_s15, %s548_s15  }
   0x3   : > { %p28_p1 = scmp.ge.s32.totalorder %s26_s18, 2  ;;  %p194_p2 = scmp.lt.s32.totalorder %s468_s17, 3 }
   0x5   : > { %s551_s18 = smov (%p28_p1, %s26_s18), 0  ;;  %p195_p3 = pnand %p402_p0, %p194_p2 }
   0x6   : > { %s403_s19 = sshll.u32 (!%p195_p3), %s460_s15, 1  ;;  %v255_v0 = vld [vmem:[%s543_s0] sm:$0x1] (!%p195_p3)  ;;  %v259_v1 = vlaneseq (!%p195_p3)  ;;  %v470_v3 = vmov (!%p195_p3), 0   ;;  %p242_p5 = scmp.lt.s32.totalorder (!%p195_p3), %s460_s15, 1 }
   0x7   : > { %198 = sbr.rel (%p195_p3) target bundleno = 257 (0x101), region = 36  ;;  %p228_p4 = scmp.lt.s32.totalorder (!%p195_p3), %s403_s19, 3  ;;  %vm257_vm0 = vcmp.gt.f32.partialorder (!%p195_p3), %v255_v0, 0.0  ;;  %v408_v33 = vld [vmem:[%s544_s1] ss:$0 sm:$0xff] (!%p195_p3) }
   0x8   : > { %v260_v2 = vshrl.u32 (!%p195_p3), %v259_v1, 7  ;;  %v258_v4 = vsel (!%p195_p3), %vm257_vm0, 1, %v470_v3 }
   0xa   : > { %v261_v5 = vsub.s32 (!%p195_p3), 0, %v260_v2 }
   0xc   : > { %v262_v6 = vrot.slane (!%p195_p3), %v258_v4, %v261_v5  ;;  %v295_v37 = vrot.slane (!%p195_p3), %v255_v0, %v261_v5 }
   0xe   : > { %s553_s19 = smov (!%p228_p4, %s403_s19), 3  ;;  %vm263_vm1 = vcmp.eq.s32.totalorder %v262_v6, 1  ;;  %s555_s15 = smov (!%p242_p5, %s460_s15), 1 }
   0xf   : > { %s404_s22 = sshll.u32 %s553_s19, 3  ;;  %s407_s5 = sshll.u32 %s555_s15, 3 }
  0x10   : > { %s231_s25 = scalar_lea.vmem %s545_s2, %s404_s22  ;;  %s239_s28 = scalar_lea.vmem %s546_s3, %s404_s22 }
  0x11   : > { %v251_v7 = vld [vmem:[%s231_s25] sm:$0xff]  ;;  %v252_v8 = vld [vmem:[%s231_s25 + $0x8] sm:$0xff]  ;;  %s245_s8 = scalar_lea.vmem %s547_s4, %s407_s5 }
  0x12   : > { %v264_v9 = vsel %vm263_vm1, %v251_v7, 0.5  ;;  %v265_v10 = vsel %vm263_vm1, %v252_v8, 0.5  ;;  %v253_v21 = vld [vmem:[%s239_s28] sm:$0xff]  ;;  %v254_v24 = vld [vmem:[%s239_s28 + $0x8] sm:$0xff] }
  0x13   : > { %438 = vlog2.f32 %v264_v9  ;;  %v272_v11 = vsub.f32 1.0, %v264_v9  ;;  %v273_v12 = vsub.f32 1.0, %v265_v10  ;;  %v288_v26 = vsub.f32 %v251_v7, %v253_v21 }
  0x14   : > { %440 = vlog2.f32 %v265_v10  ;;  %v289_v28 = vsub.f32 %v252_v8, %v254_v24 }
  0x15   : > { %442 = vlog2.f32 %v272_v11  ;;  %v290_v32 = vmul.f32 %v288_v26, %v288_v26 }
  0x16   : > { %444 = vlog2.f32 %v273_v12  ;;  %v291_v35 = vmul.f32 %v289_v28, %v289_v28 }
  0x17   : > { %v302_v40 = vmul.f32 %v408_v33, %v290_v32 }
  0x18   : > { %v303_v42 = vmul.f32 %v408_v33, %v291_v35 }
  0x1d   : > { %v439_v13 = vpop.eup %438 }
  0x1e   : > { %v441_v14 = vpop.eup %440  ;;  %v267_v15 = vmul.f32 0.6931472, %v439_v13 }
  0x1f   : > { %v443_v16 = vpop.eup %442  ;;  %v269_v17 = vmul.f32 0.6931472, %v441_v14 }
  0x20   : > { %v445_v18 = vpop.eup %444  ;;  %v270_v19 = vmax.f32 %v267_v15, -100.0  ;;  %v275_v20 = vmul.f32 0.6931472, %v443_v16 }
  0x21   : > { %v271_v22 = vmax.f32 %v269_v17, -100.0  ;;  %v277_v23 = vmul.f32 0.6931472, %v445_v18 }
  0x22   : > { %v278_v25 = vmax.f32 %v275_v20, -100.0 }
  0x23   : > { %v279_v27 = vmax.f32 %v277_v23, -100.0 }
  0x24   : > { %v280_v29 = vsub.f32 %v270_v19, %v278_v25 }
  0x25   : > { %v281_v30 = vsub.f32 %v271_v22, %v279_v27 }
  0x26   : > { %v282_v31 = vmul.f32 %v280_v29, %v253_v21 }
  0x27   : > { %v283_v34 = vmul.f32 %v281_v30, %v254_v24 }
  0x28   : > { %v284_v36 = vadd.f32 %v282_v31, %v278_v25 }
  0x29   : > { %v285_v38 = vadd.f32 %v283_v34, %v279_v27 }
  0x2a   : > { %v286_v39 = vsub.f32 0.0, %v284_v36 }
  0x2b   : > { %v287_v41 = vsub.f32 0.0, %v285_v38 }
  0x2c   : > { %v296_v43 = vmul.f32 %v295_v37, %v286_v39 }
  0x2d   : > { %v297_v44 = vmul.f32 %v295_v37, %v287_v41 }
  0x2e   : > { %v304_v45 = vadd.f32 %v302_v40, %v296_v43 }
  0x2f   : > { %v305_v46 = vadd.f32 %v303_v42, %v297_v44 }
  0x31   : > { %v307_v47 = vadd.f32 %v305_v46, %v304_v45 }
  0x33   : > { %314 = vadd.xlane.f32.xlu0 %v307_v47 }
  0xc0   : > { %v315_v48 = vpop.xlane.xlu0 %314 }
  0xc1   : > { %v316_v49 = vrot.slane %v315_v48, 4 }
  0xc3   : > { %v317_v50 = vadd.f32 %v316_v49, %v315_v48 }
  0xc5   : > { %v318_v51 = vrot.slane %v317_v50, 2 }
  0xc7   : > { %v319_v52 = vadd.f32 %v318_v51, %v317_v50 }
  0xc9   : > { %v320_v53 = vrot.slane %v319_v52, 1 }
  0xcb   : > { %v321_v54 = vadd.f32 %v320_v53, %v319_v52 }
  0xcd   : > { %411 = vpush %v321_v54 }
  0xfe   : > { %s412_s9 = spop %411 }
  0xff   : > { %v323_v55 = vstv %s412_s9 }
 0x100   : > { %324 = vst [vmem:[%s245_s8] sm:$0xff] %v323_v55 }
 0x101 PF: > { %s14_s17 = sadd.s32 1, %s468_s17   ;;  %s548_s15 = smov %s464_s16 }
 0x102   : > { %p11_p6 = scmp.ge.s32.totalorder %s14_s17, 4   ;;  %s549_s16 = smov %s551_s18 }
 0x104   :  { %13 = sbr.rel (!%p11_p6) target bundleno = 2 (0x2), region = 77 }

</bundles_post_ra>
